<compile_context>
chip_gen: v6e
topology: v6e:2x2x1
jax: 0.10.0
libtpu: 0.0.40
codegen_flags: <defaults>
</compile_context>

<pallas_src>
import functools

import jax
import jax.numpy as jnp
from jax.experimental import pallas as pl
from jax.experimental.pallas import tpu as pltpu


def _round_up(x, m):
    return ((x + m - 1) // m) * m


def _autoencoder_kernel(x_ref,
                        w1_ref, b1_ref,
                        w2_ref, b2_ref,
                        w3_ref, b3_ref,
                        w4_ref, b4_ref,
                        out_ref):
    """Full forward (4 matmuls + 3 ReLUs) on one batch tile.

    Matmuls run on the MXU with f32 accumulation (preferred_element_type);
    intermediate activations stay f32 -- they never touch HBM, so keeping
    them wide is free bandwidth-wise and strictly better numerically.
    """
    x = x_ref[...]

    # encoder: Linear -> ReLU -> Linear -> ReLU
    h1 = jnp.dot(x, w1_ref[...], preferred_element_type=jnp.float32)
    h1 = jnp.maximum(h1 + b1_ref[...].astype(jnp.float32), 0.0)

    z = jnp.dot(h1, w2_ref[...].astype(jnp.float32),
                preferred_element_type=jnp.float32)
    z = jnp.maximum(z + b2_ref[...].astype(jnp.float32), 0.0)

    # decoder: Linear -> ReLU -> Linear (no final activation, matches PyTorch)
    h2 = jnp.dot(z, w3_ref[...].astype(jnp.float32),
                 preferred_element_type=jnp.float32)
    h2 = jnp.maximum(h2 + b3_ref[...].astype(jnp.float32), 0.0)

    y = jnp.dot(h2, w4_ref[...].astype(jnp.float32),
                preferred_element_type=jnp.float32)
    y = y + b4_ref[...].astype(jnp.float32)

    out_ref[...] = y.astype(out_ref.dtype)


def prepare_params(params):
    """One-time (load-time) padding of the hidden/encoding weight dims to 128.

    The input/output feature dim D is deliberately left unpadded so x and the
    output stream only their true bytes. Padding is numerically exact: padded
    weight columns + zero bias give 0 pre-activations, ReLU(0) = 0, and padded
    weight rows only ever multiply those zero activations.
    """
    w1, b1 = params["w1"], params["b1"]   # (D, H), (1, H)
    w2, b2 = params["w2"], params["b2"]   # (H, E), (1, E)
    w3, b3 = params["w3"], params["b3"]   # (E, H), (1, H)
    w4, b4 = params["w4"], params["b4"]   # (H, D), (1, D)
    H = w1.shape[1]
    E = w2.shape[1]
    H_pad = _round_up(H, 128)
    E_pad = _round_up(E, 128)
    return {
        "w1": jnp.pad(w1, ((0, 0), (0, H_pad - H))),
        "b1": jnp.pad(b1, ((0, 0), (0, H_pad - H))),
        "w2": jnp.pad(w2, ((0, H_pad - H), (0, E_pad - E))),
        "b2": jnp.pad(b2, ((0, 0), (0, E_pad - E))),
        "w3": jnp.pad(w3, ((0, E_pad - E), (0, H_pad - H))),
        "b3": jnp.pad(b3, ((0, 0), (0, H_pad - H))),
        "w4": jnp.pad(w4, ((0, H_pad - H), (0, 0))),
        "b4": b4,
    }


def _choose_tile(B, D, itemsize, weight_bytes, batch_tile):
    """Pick the batch tile and padded batch size.

    Constraints: tile is a multiple of 8; 2 in + 2 out pipeline buffers plus
    resident weights fit a v7x-safe ~44 MiB VMEM budget; larger batches keep
    >=4 grid steps (>=2 per v7x TensorCore) for DMA/compute overlap; batch
    padding waste is <8 rows per grid step.
    """
    B8 = _round_up(B, 8)
    tile = max(8, (batch_tile // 8) * 8)

    # VMEM budget (v7x has 64 MiB; v5e/v6e have 128 MiB -- use the tight one).
    budget = 44 * 1024 * 1024
    max_by_vmem = max(8, ((budget - weight_bytes) // (4 * D * itemsize)) // 8 * 8)
    tile = min(tile, max_by_vmem)

    # Keep >=4 grid steps when each step would still get >=128 rows.
    if B8 >= 4 * 128:
        tile = min(tile, max(128, _round_up(pl.cdiv(B8, 4), 8)))

    if B8 <= tile:
        return B8, B8

    # Split evenly: per-step padding waste stays below 8 rows.
    n_steps = pl.cdiv(B8, tile)
    tile = _round_up(pl.cdiv(B8, n_steps), 8)
    return tile, n_steps * tile


@functools.partial(jax.jit, static_argnames=("batch_tile",))
def small_autoencoder_forward(x, padded_params, batch_tile=1024):
    """x: (B, D); padded_params: output of prepare_params (hidden dims padded)."""
    B, D = x.shape
    pp = padded_params
    itemsize = jnp.dtype(x.dtype).itemsize
    weight_bytes = sum(int(a.size) * jnp.dtype(a.dtype).itemsize
                       for a in jax.tree_util.tree_leaves(pp))
    tile, B_pad = _choose_tile(B, D, itemsize, weight_bytes, batch_tile)

    # Only pad the batch (to a multiple of the tile); feature dim stays D.
    x_p = x if B_pad == B else jnp.pad(x, ((0, B_pad - B), (0, 0)))
    grid = (B_pad // tile,)

    x_map = lambda i: (i, 0)
    const_map = lambda i: (0, 0)
    full = lambda a: pl.BlockSpec(a.shape, const_map)  # weights resident in VMEM

    # VMEM cap derived from the tile; stays <=48 MiB so it is safe on v7x too.
    vmem_needed = 4 * tile * D * itemsize + weight_bytes + (2 << 20)
    vmem_limit = int(min(max(vmem_needed, 8 << 20), 48 << 20))

    out_p = pl.pallas_call(
        _autoencoder_kernel,
        out_shape=jax.ShapeDtypeStruct((B_pad, D), x.dtype),
        grid_spec=pltpu.PrefetchScalarGridSpec(
            num_scalar_prefetch=0,
            grid=grid,
            in_specs=[
                pl.BlockSpec((tile, D), x_map),      # x tile, true feature dim
                full(pp["w1"]), full(pp["b1"]),
                full(pp["w2"]), full(pp["b2"]),
                full(pp["w3"]), full(pp["b3"]),
                full(pp["w4"]), full(pp["b4"]),
            ],
            out_specs=pl.BlockSpec((tile, D), x_map),
        ),
        compiler_params=pltpu.CompilerParams(
            dimension_semantics=("parallel",),       # shards batch across v7x TCs
            vmem_limit_bytes=vmem_limit,
        ),
    )(x_p, pp["w1"], pp["b1"], pp["w2"], pp["b2"],
      pp["w3"], pp["b3"], pp["w4"], pp["b4"])

    return out_p if B_pad == B else out_p[:B]


def init_params(key, input_dim, encoding_dim=5, dtype=jnp.float32):
    """Deterministic init mirroring nn.Linear default U(-1/sqrt(fan_in), +)."""
    hidden = min(64, input_dim)
    dims = [(input_dim, hidden),     # encoder linear 1
            (hidden, encoding_dim),  # encoder linear 2
            (encoding_dim, hidden),  # decoder linear 1
            (hidden, input_dim)]     # decoder linear 2
    params = {}
    for idx, (fan_in, fan_out) in enumerate(dims, start=1):
        key, kw, kb = jax.random.split(key, 3)
        bound = 1.0 / jnp.sqrt(fan_in)
        # Store weight directly in (in, out) layout (== PyTorch weight.T).
        params[f"w{idx}"] = jax.random.uniform(
            kw, (fan_in, fan_out), dtype, minval=-bound, maxval=bound)
        params[f"b{idx}"] = jax.random.uniform(
            kb, (1, fan_out), dtype, minval=-bound, maxval=bound)
    return params


def reference_forward(x, params):
    """Plain-JAX reference of the same forward pass (f32)."""
    h = jnp.maximum(x @ params["w1"] + params["b1"], 0.0)
    z = jnp.maximum(h @ params["w2"] + params["b2"], 0.0)
    h2 = jnp.maximum(z @ params["w3"] + params["b3"], 0.0)
    return h2 @ params["w4"] + params["b4"]


if __name__ == "__main__":
    key = jax.random.PRNGKey(0)
    key, kx, kp = jax.random.split(key, 3)

    batch, input_dim, encoding_dim = 512, 32, 5
    x = jax.random.normal(kx, (batch, input_dim), jnp.float32)
    params = init_params(kp, input_dim, encoding_dim)
    pp = prepare_params(params)          # padded once, reused across calls

    # f32 run (4 grid steps of 128 rows) + exact correctness check.
    out = small_autoencoder_forward(x, pp)
    out = jax.block_until_ready(out)
    ref = reference_forward(x, params)
    assert out.shape == (batch, input_dim)
    assert jnp.allclose(out, ref, atol=1e-5, rtol=1e-5), "mismatch vs reference"

    # bf16 storage path (halves HBM bytes on this memory-bound shape; matmul
    # accumulation and all intermediate activations stay f32 in the kernel).
    x_bf16 = x.astype(jnp.bfloat16)
    pp_bf16 = jax.tree_util.tree_map(lambda a: a.astype(jnp.bfloat16), pp)
    out_bf16 = small_autoencoder_forward(x_bf16, pp_bf16)
    out_bf16 = jax.block_until_ready(out_bf16)
    assert out_bf16.shape == (batch, input_dim)
    assert bool(jnp.all(jnp.isfinite(out_bf16.astype(jnp.float32))))
    assert jnp.allclose(out_bf16.astype(jnp.float32), ref, atol=7e-2, rtol=7e-2)

    print("KERNEL_OK")
</pallas_src>

<mosaic_0001>
module attributes {stable_mosaic.version = 11 : i64} {
  func.func @_autoencoder_kernel(%arg0: i32, %arg1: memref<128x32xf32, #tpu.memory_space<vmem>>, %arg2: memref<32x128xf32, #tpu.memory_space<vmem>>, %arg3: memref<1x128xf32, #tpu.memory_space<vmem>>, %arg4: memref<128x128xf32, #tpu.memory_space<vmem>>, %arg5: memref<1x128xf32, #tpu.memory_space<vmem>>, %arg6: memref<128x128xf32, #tpu.memory_space<vmem>>, %arg7: memref<1x128xf32, #tpu.memory_space<vmem>>, %arg8: memref<128x32xf32, #tpu.memory_space<vmem>>, %arg9: memref<1x32xf32, #tpu.memory_space<vmem>>, %arg10: memref<128x32xf32, #tpu.memory_space<vmem>>) attributes {dimension_semantics = [#tpu.dimension_semantics<parallel>], iteration_bounds = array<i64: 4>, scalar_prefetch = 0 : i64, scratch_operands = 0 : i64, tpu.core_type = #tpu.core_type<tc>, window_params = [{transform_indices = @transform_0, window_bounds = array<i64: 128, 32>}, {pipeline_mode = #tpu.pipeline_mode<synchronous>, transform_indices = @transform_1, window_bounds = array<i64: 32, 128>}, {pipeline_mode = #tpu.pipeline_mode<synchronous>, transform_indices = @transform_2, window_bounds = array<i64: 1, 128>}, {pipeline_mode = #tpu.pipeline_mode<synchronous>, transform_indices = @transform_3, window_bounds = array<i64: 128, 128>}, {pipeline_mode = #tpu.pipeline_mode<synchronous>, transform_indices = @transform_4, window_bounds = array<i64: 1, 128>}, {pipeline_mode = #tpu.pipeline_mode<synchronous>, transform_indices = @transform_5, window_bounds = array<i64: 128, 128>}, {pipeline_mode = #tpu.pipeline_mode<synchronous>, transform_indices = @transform_6, window_bounds = array<i64: 1, 128>}, {pipeline_mode = #tpu.pipeline_mode<synchronous>, transform_indices = @transform_7, window_bounds = array<i64: 128, 32>}, {pipeline_mode = #tpu.pipeline_mode<synchronous>, transform_indices = @transform_8, window_bounds = array<i64: 1, 32>}, {transform_indices = @transform_9, window_bounds = array<i64: 128, 32>}]} {
    %c0 = arith.constant 0 : index
    %c0_0 = arith.constant 0 : index
    %0 = vector.load %arg1[%c0, %c0_0] : memref<128x32xf32, #tpu.memory_space<vmem>>, vector<128x32xf32>
    %c0_1 = arith.constant 0 : index
    %c0_2 = arith.constant 0 : index
    %1 = vector.load %arg2[%c0_1, %c0_2] : memref<32x128xf32, #tpu.memory_space<vmem>>, vector<32x128xf32>
    %cst = arith.constant dense<0.000000e+00> : vector<128x128xf32>
    %2 = tpu.matmul %0, %1, %cst {dimension_numbers = #tpu.dot_dimension_numbers<[1], [0], [0], [1], [0, 0, 1, 1], [], []>} : vector<128x32xf32>, vector<32x128xf32>, vector<128x128xf32> -> vector<128x128xf32>
    %c0_3 = arith.constant 0 : index
    %c0_4 = arith.constant 0 : index
    %3 = vector.load %arg3[%c0_3, %c0_4] : memref<1x128xf32, #tpu.memory_space<vmem>>, vector<1x128xf32>
    %4 = vector.broadcast %3 : vector<1x128xf32> to vector<128x128xf32>
    %5 = arith.addf %2, %4 : vector<128x128xf32>
    %cst_5 = arith.constant 0.000000e+00 : f32
    %6 = vector.broadcast %cst_5 : f32 to vector<128x128xf32>
    %7 = arith.maximumf %5, %6 : vector<128x128xf32>
    %c0_6 = arith.constant 0 : index
    %c0_7 = arith.constant 0 : index
    %8 = vector.load %arg4[%c0_6, %c0_7] : memref<128x128xf32, #tpu.memory_space<vmem>>, vector<128x128xf32>
    %cst_8 = arith.constant dense<0.000000e+00> : vector<128x128xf32>
    %9 = tpu.matmul %7, %8, %cst_8 {dimension_numbers = #tpu.dot_dimension_numbers<[1], [0], [0], [1], [0, 0, 1, 1], [], []>} : vector<128x128xf32>, vector<128x128xf32>, vector<128x128xf32> -> vector<128x128xf32>
    %c0_9 = arith.constant 0 : index
    %c0_10 = arith.constant 0 : index
    %10 = vector.load %arg5[%c0_9, %c0_10] : memref<1x128xf32, #tpu.memory_space<vmem>>, vector<1x128xf32>
    %11 = vector.broadcast %10 : vector<1x128xf32> to vector<128x128xf32>
    %12 = arith.addf %9, %11 : vector<128x128xf32>
    %cst_11 = arith.constant 0.000000e+00 : f32
    %13 = vector.broadcast %cst_11 : f32 to vector<128x128xf32>
    %14 = arith.maximumf %12, %13 : vector<128x128xf32>
    %c0_12 = arith.constant 0 : index
    %c0_13 = arith.constant 0 : index
    %15 = vector.load %arg6[%c0_12, %c0_13] : memref<128x128xf32, #tpu.memory_space<vmem>>, vector<128x128xf32>
    %cst_14 = arith.constant dense<0.000000e+00> : vector<128x128xf32>
    %16 = tpu.matmul %14, %15, %cst_14 {dimension_numbers = #tpu.dot_dimension_numbers<[1], [0], [0], [1], [0, 0, 1, 1], [], []>} : vector<128x128xf32>, vector<128x128xf32>, vector<128x128xf32> -> vector<128x128xf32>
    %c0_15 = arith.constant 0 : index
    %c0_16 = arith.constant 0 : index
    %17 = vector.load %arg7[%c0_15, %c0_16] : memref<1x128xf32, #tpu.memory_space<vmem>>, vector<1x128xf32>
    %18 = vector.broadcast %17 : vector<1x128xf32> to vector<128x128xf32>
    %19 = arith.addf %16, %18 : vector<128x128xf32>
    %cst_17 = arith.constant 0.000000e+00 : f32
    %20 = vector.broadcast %cst_17 : f32 to vector<128x128xf32>
    %21 = arith.maximumf %19, %20 : vector<128x128xf32>
    %c0_18 = arith.constant 0 : index
    %c0_19 = arith.constant 0 : index
    %22 = vector.load %arg8[%c0_18, %c0_19] : memref<128x32xf32, #tpu.memory_space<vmem>>, vector<128x32xf32>
    %cst_20 = arith.constant dense<0.000000e+00> : vector<128x32xf32>
    %23 = tpu.matmul %21, %22, %cst_20 {dimension_numbers = #tpu.dot_dimension_numbers<[1], [0], [0], [1], [0, 0, 1, 1], [], []>} : vector<128x128xf32>, vector<128x32xf32>, vector<128x32xf32> -> vector<128x32xf32>
    %c0_21 = arith.constant 0 : index
    %c0_22 = arith.constant 0 : index
    %24 = vector.load %arg9[%c0_21, %c0_22] : memref<1x32xf32, #tpu.memory_space<vmem>>, vector<1x32xf32>
    %25 = vector.broadcast %24 : vector<1x32xf32> to vector<128x32xf32>
    %26 = arith.addf %23, %25 : vector<128x32xf32>
    %c0_23 = arith.constant 0 : index
    %c0_24 = arith.constant 0 : index
    %27 = vector.load %arg10[%c0_23, %c0_24] : memref<128x32xf32, #tpu.memory_space<vmem>>, vector<128x32xf32>
    tpu.vector_store %arg10[%c0_23, %c0_24], %26 {strides = array<i32>} : memref<128x32xf32, #tpu.memory_space<vmem>>, vector<128x32xf32>,
    return
  }
  func.func @transform_0(%arg0: i32) -> (i32, i32) {
    %c0_i32 = arith.constant 0 : i32
    %c0_i32_0 = arith.constant 0 : i32
    return %arg0, %c0_i32 : i32, i32
  }
  func.func @transform_1(%arg0: i32) -> (i32, i32) {
    %c0_i32 = arith.constant 0 : i32
    %c0_i32_0 = arith.constant 0 : i32
    %c0_i32_1 = arith.constant 0 : i32
    return %c0_i32, %c0_i32_0 : i32, i32
  }
  func.func @transform_2(%arg0: i32) -> (i32, i32) {
    %c0_i32 = arith.constant 0 : i32
    %c0_i32_0 = arith.constant 0 : i32
    %c0_i32_1 = arith.constant 0 : i32
    return %c0_i32, %c0_i32_0 : i32, i32
  }
  func.func @transform_3(%arg0: i32) -> (i32, i32) {
    %c0_i32 = arith.constant 0 : i32
    %c0_i32_0 = arith.constant 0 : i32
    %c0_i32_1 = arith.constant 0 : i32
    return %c0_i32, %c0_i32_0 : i32, i32
  }
  func.func @transform_4(%arg0: i32) -> (i32, i32) {
    %c0_i32 = arith.constant 0 : i32
    %c0_i32_0 = arith.constant 0 : i32
    %c0_i32_1 = arith.constant 0 : i32
    return %c0_i32, %c0_i32_0 : i32, i32
  }
  func.func @transform_5(%arg0: i32) -> (i32, i32) {
    %c0_i32 = arith.constant 0 : i32
    %c0_i32_0 = arith.constant 0 : i32
    %c0_i32_1 = arith.constant 0 : i32
    return %c0_i32, %c0_i32_0 : i32, i32
  }
  func.func @transform_6(%arg0: i32) -> (i32, i32) {
    %c0_i32 = arith.constant 0 : i32
    %c0_i32_0 = arith.constant 0 : i32
    %c0_i32_1 = arith.constant 0 : i32
    return %c0_i32, %c0_i32_0 : i32, i32
  }
  func.func @transform_7(%arg0: i32) -> (i32, i32) {
    %c0_i32 = arith.constant 0 : i32
    %c0_i32_0 = arith.constant 0 : i32
    %c0_i32_1 = arith.constant 0 : i32
    return %c0_i32, %c0_i32_0 : i32, i32
  }
  func.func @transform_8(%arg0: i32) -> (i32, i32) {
    %c0_i32 = arith.constant 0 : i32
    %c0_i32_0 = arith.constant 0 : i32
    %c0_i32_1 = arith.constant 0 : i32
    return %c0_i32, %c0_i32_0 : i32, i32
  }
  func.func @transform_9(%arg0: i32) -> (i32, i32) {
    %c0_i32 = arith.constant 0 : i32
    %c0_i32_0 = arith.constant 0 : i32
    return %arg0, %c0_i32 : i32, i32
  }
}

</mosaic_0001>

<bundles_post_ra>
// kernel: small_autoencoder_forward.1
= control target key start
LH: loop header
LB: loop body
LE: loop exit
PB: predicated region body
PF: predicated region fallthrough
CT: control target
= control target key end

     0   :  { %s1626_s30 = smov 0   ;;  %s1952_s0 = inlined_call_operand.vmem [shape: f32[512,32], index: 0, kind: input, shape index: {}]   ;;  %s1953_s1 = inlined_call_operand.vmem [shape: f32[32,128], index: 1, kind: input, shape index: {}]   ;;  %s1954_s2 = inlined_call_operand.vmem [shape: f32[1,128], index: 2, kind: input, shape index: {}]   ;;  %s1955_s3 = inlined_call_operand.vmem [shape: f32[128,128], index: 3, kind: input, shape index: {}]   ;;  %s1956_s4 = inlined_call_operand.vmem [shape: f32[1,128], index: 4, kind: input, shape index: {}]   ;;  %s1957_s5 = inlined_call_operand.vmem [shape: f32[128,128], index: 5, kind: input, shape index: {}]   ;;  %s1958_s6 = inlined_call_operand.vmem [shape: f32[1,128], index: 6, kind: input, shape index: {}]   ;;  %s1959_s7 = inlined_call_operand.vmem [shape: f32[128,32], index: 7, kind: input, shape index: {}]   ;;  %s1960_s8 = inlined_call_operand.vmem [shape: f32[1,32], index: 8, kind: input, shape index: {}]   ;;  %s1961_s9 = inlined_call_operand.vmem [shape: f32[512,32], index: 9, kind: output, shape index: {}]  }
   0x1 LB: > { %s1181_s10 = sadd.s32 4294967295, %s1574_s30   ;;  %p1185_p0 = scmp.ge.s32.totalorder %s1574_s30, 1  ;;  %s1574_s30 = sphi %s1626_s30, %s19_s30  }
   0x2   : > { %p288_p1 = scmp.lt.s32.totalorder %s1574_s30, 5 }
   0x4   : > { %p289_p2 = pnand %p1185_p0, %p288_p1 }
   0x5   : > { %s1186_s15 = sshll.u32 (!%p289_p2), %s1181_s10, 4 }
   0x6   : > { %292 = sbr.rel (%p289_p2) target bundleno = 846 (0x34e), region = 56  ;;  %p325_p3 = scmp.lt.s32.totalorder (!%p289_p2), %s1186_s15, 63 }
   0xb   : > { %v355_v0 = vld [vmem:[%s1953_s1 + $0x18] sm:$0xff]  ;;  %v354_v1 = vld [vmem:[%s1953_s1 + $0x10] sm:$0xff]  ;;  %v353_v4 = vld [vmem:[%s1953_s1 + $0x8] sm:$0xff]  ;;  %s1963_s15 = smov (!%p325_p3, %s1186_s15), 63  ;;  %vm363_vm0 = vcmask 261120  }
   0xc   : > { %1328 = vmatprep.subr.mxu0 %v355_v0  ;;  %v588_v2 = vld [vmem:[%s1955_s3 + $0x78] sm:$0xff]  ;;  %v587_v3 = vld [vmem:[%s1955_s3 + $0x70] sm:$0xff]  ;;  %v586_v5 = vld [vmem:[%s1955_s3 + $0x68] sm:$0xff]  ;;  %s1187_s26 = sshll.u32 %s1963_s15, 3 }
   0xd   : > { %1329 = vmatpush3.msra.mxu0 %v355_v0  ;;  %1360 = vmatprep.subr.mxu1 %v588_v2  ;;  %v352_v6 = vld [vmem:[%s1953_s1] sm:$0xff]  ;;  %s1663_s29 = scalar_lea.vmem %s1952_s0, %s1187_s26  ;;  %v584_v11 = vld [vmem:[%s1955_s3 + $0x58] sm:$0xff]  ;;  %v583_v13 = vld [vmem:[%s1955_s3 + $0x50] sm:$0xff]  ;;  %s1915_s21 = scalar_lea.vmem %s1961_s9, %s1187_s26 }
   0xe   : > { %1330 = vmatprep.subr.mxu0 %v354_v1  ;;  %1361 = vmatpush3.msra.mxu1 %v588_v2  ;;  %v585_v7 = vld [vmem:[%s1955_s3 + $0x60] sm:$0xff]  ;;  %v337_v9 = vld [vmem:[%s1663_s29 + $0x8] sm:$0xff]  ;;  %v338_v10 = vld [vmem:[%s1663_s29 + $0x10] sm:$0xff] }
   0xf   : > { %1331 = vmatpush3.msra.mxu0 %v354_v1  ;;  %1362 = vmatprep.subr.mxu1 %v587_v3  ;;  %v336_v8 = vld [vmem:[%s1663_s29] sm:$0xff]  ;;  %v339_v12 = vld [vmem:[%s1663_s29 + $0x18] sm:$0xff]  ;;  %v582_v15 = vld [vmem:[%s1955_s3 + $0x48] sm:$0xff] }
  0x10   : > { %1332 = vmatprep.subr.mxu0 %v353_v4  ;;  %1363 = vmatpush3.msra.mxu1 %v587_v3  ;;  %v340_v14 = vld [vmem:[%s1663_s29 + $0x20] sm:$0xff]  ;;  %v341_v16 = vld [vmem:[%s1663_s29 + $0x28] sm:$0xff]  ;;  %v342_v18 = vld [vmem:[%s1663_s29 + $0x30] sm:$0xff] }
  0x11   : > { %1333 = vmatpush3.msra.mxu0 %v353_v4  ;;  %1364 = vmatprep.subr.mxu1 %v586_v5  ;;  %v581_v17 = vld [vmem:[%s1955_s3 + $0x40] sm:$0xff]  ;;  %v580_v19 = vld [vmem:[%s1955_s3 + $0x38] sm:$0xff]  ;;  %v579_v21 = vld [vmem:[%s1955_s3 + $0x30] sm:$0xff] }
  0x12   : > { %1334 = vmatprep.subr.mxu0 %v352_v6  ;;  %1365 = vmatpush3.msra.mxu1 %v586_v5  ;;  %v343_v20 = vld [vmem:[%s1663_s29 + $0x38] sm:$0xff]  ;;  %v344_v22 = vld [vmem:[%s1663_s29 + $0x40] sm:$0xff]  ;;  %v578_v23 = vld [vmem:[%s1955_s3 + $0x28] sm:$0xff] }
  0x13   : > { %1335 = vmatpush3.msra.mxu0 %v352_v6  ;;  %1336 = vmatprep.mubr.msk.f32.mxu0 %vm363_vm0, %v336_v8  ;;  %v345_v24 = vld [vmem:[%s1663_s29 + $0x48] sm:$0xff]  ;;  %v577_v25 = vld [vmem:[%s1955_s3 + $0x20] sm:$0xff]  ;;  %v346_v26 = vld [vmem:[%s1663_s29 + $0x50] sm:$0xff] }
  0x14   : > { %1337 = vmatmul.mubr.msk.f32.vlgmr.msra.gmra.mxu0 %vm363_vm0, %v337_v9  ;;  %1366 = vmatprep.subr.mxu1 %v585_v7  ;;  %v347_v27 = vld [vmem:[%s1663_s29 + $0x58] sm:$0xff]  ;;  %v348_v28 = vld [vmem:[%s1663_s29 + $0x60] sm:$0xff]  ;;  %v349_v29 = vld [vmem:[%s1663_s29 + $0x68] sm:$0xff] }
  0x15   : > { %1339 = vmatprep.mubr.msk.f32.mxu0 %vm363_vm0, %v338_v10  ;;  %1367 = vmatpush3.msra.mxu1 %v585_v7  ;;  %v350_v30 = vld [vmem:[%s1663_s29 + $0x70] sm:$0xff]  ;;  %v351_v31 = vld [vmem:[%s1663_s29 + $0x78] sm:$0xff]  ;;  %v574_v34 = vld [vmem:[%s1955_s3 + $0x8] sm:$0xff] }
  0x16   : > { %1368 = vmatprep.subr.mxu1 %v584_v11  ;;  %v576_v32 = vld [vmem:[%s1955_s3 + $0x18] sm:$0xff]  ;;  %v575_v33 = vld [vmem:[%s1955_s3 + $0x10] sm:$0xff]  ;;  %v573_v35 = vld [vmem:[%s1955_s3] sm:$0xff] }
  0x17   : > { %1369 = vmatpush3.msra.mxu1 %v584_v11  ;;  %v772_v36 = vld [vmem:[%s1957_s5 + $0x78] sm:$0xff]  ;;  %v771_v37 = vld [vmem:[%s1957_s5 + $0x70] sm:$0xff]  ;;  %v770_v38 = vld [vmem:[%s1957_s5 + $0x68] sm:$0xff] }
  0x18   : > { %1340 = vmatmul.mubr.msk.f32.gmra.mxu0 %vm363_vm0, %v339_v12  ;;  %1370 = vmatprep.subr.mxu1 %v583_v13  ;;  %v769_v39 = vld [vmem:[%s1957_s5 + $0x60] sm:$0xff]  ;;  %v768_v40 = vld [vmem:[%s1957_s5 + $0x58] sm:$0xff]  ;;  %v767_v41 = vld [vmem:[%s1957_s5 + $0x50] sm:$0xff] }
  0x19   : > { %1342 = vmatprep.mubr.msk.f32.mxu0 %vm363_vm0, %v340_v14  ;;  %1371 = vmatpush3.msra.mxu1 %v583_v13  ;;  %v766_v42 = vld [vmem:[%s1957_s5 + $0x48] sm:$0xff]  ;;  %v765_v43 = vld [vmem:[%s1957_s5 + $0x40] sm:$0xff]  ;;  %v764_v44 = vld [vmem:[%s1957_s5 + $0x38] sm:$0xff] }
  0x1a   : > { %1372 = vmatprep.subr.mxu1 %v582_v15  ;;  %1416 = vmatprep.subr.mxu0 %v772_v36  ;;  %v763_v45 = vld [vmem:[%s1957_s5 + $0x30] sm:$0xff]  ;;  %v762_v46 = vld [vmem:[%s1957_s5 + $0x28] sm:$0xff]  ;;  %v761_v47 = vld [vmem:[%s1957_s5 + $0x20] sm:$0xff] }
  0x1b   : > { %1373 = vmatpush3.msra.mxu1 %v582_v15  ;;  %1417 = vmatpush3.msra.mxu0 %v772_v36  ;;  %v760_v48 = vld [vmem:[%s1957_s5 + $0x18] sm:$0xff]  ;;  %v1190_v49 = vld [vmem:[%s1954_s2] ss:$0 sm:$0xff] }
  0x1c   : > { %1343 = vmatmul.mubr.msk.f32.gmra.mxu0 %vm363_vm0, %v341_v16  ;;  %1374 = vmatprep.subr.mxu1 %v581_v17  ;;  %v757_v36 = vld [vmem:[%s1957_s5] sm:$0xff] }
  0x1d   : > { %1345 = vmatprep.mubr.msk.f32.mxu0 %vm363_vm0, %v342_v18  ;;  %1375 = vmatpush3.msra.mxu1 %v581_v17 }
  0x1e   : > { %1376 = vmatprep.subr.mxu1 %v580_v19  ;;  %1418 = vmatprep.subr.mxu0 %v771_v37 }
  0x1f   : > { %1377 = vmatpush3.msra.mxu1 %v580_v19  ;;  %1419 = vmatpush3.msra.mxu0 %v771_v37  ;;  %v956_v37 = vld [vmem:[%s1959_s7 + $0x78] sm:$0xff] }
  0x20   : > { %1346 = vmatmul.mubr.msk.f32.gmra.mxu0 %vm363_vm0, %v343_v20  ;;  %1378 = vmatprep.subr.mxu1 %v579_v21 }
  0x21   : > { %1348 = vmatprep.mubr.msk.f32.mxu0 %vm363_vm0, %v344_v22  ;;  %1379 = vmatpush3.msra.mxu1 %v579_v21 }
  0x22   : > { %1380 = vmatprep.subr.mxu1 %v578_v23  ;;  %1420 = vmatprep.subr.mxu0 %v770_v38 }
  0x23   : > { %1381 = vmatpush3.msra.mxu1 %v578_v23  ;;  %1421 = vmatpush3.msra.mxu0 %v770_v38  ;;  %v955_v38 = vld [vmem:[%s1959_s7 + $0x70] sm:$0xff] }
  0x24   : > { %1349 = vmatmul.mubr.msk.f32.gmra.mxu0 %vm363_vm0, %v345_v24  ;;  %1382 = vmatprep.subr.mxu1 %v577_v25 }
  0x25   : > { %1351 = vmatprep.mubr.msk.f32.mxu0 %vm363_vm0, %v346_v26  ;;  %1383 = vmatpush3.msra.mxu1 %v577_v25 }
  0x26   : > { %1384 = vmatprep.subr.mxu1 %v576_v32  ;;  %1422 = vmatprep.subr.mxu0 %v769_v39 }
  0x27   : > { %1385 = vmatpush3.msra.mxu1 %v576_v32  ;;  %1423 = vmatpush3.msra.mxu0 %v769_v39  ;;  %v954_v39 = vld [vmem:[%s1959_s7 + $0x68] sm:$0xff] }
  0x28   : > { %1352 = vmatmul.mubr.msk.f32.gmra.mxu0 %vm363_vm0, %v347_v27  ;;  %1386 = vmatprep.subr.mxu1 %v575_v33 }
  0x29   : > { %1354 = vmatprep.mubr.msk.f32.mxu0 %vm363_vm0, %v348_v28  ;;  %1387 = vmatpush3.msra.mxu1 %v575_v33 }
  0x2a   : > { %1388 = vmatprep.subr.mxu1 %v574_v34  ;;  %1424 = vmatprep.subr.mxu0 %v768_v40 }
  0x2b   : > { %1389 = vmatpush3.msra.mxu1 %v574_v34  ;;  %1425 = vmatpush3.msra.mxu0 %v768_v40  ;;  %v759_v34 = vld [vmem:[%s1957_s5 + $0x10] sm:$0xff]  ;;  %v953_v40 = vld [vmem:[%s1959_s7 + $0x60] sm:$0xff] }
  0x2c   : > { %1355 = vmatmul.mubr.msk.f32.gmra.mxu0 %vm363_vm0, %v349_v29  ;;  %1390 = vmatprep.subr.mxu1 %v573_v35 }
  0x2d   : > { %1357 = vmatprep.mubr.msk.f32.mxu0 %vm363_vm0, %v350_v30  ;;  %1391 = vmatpush3.msra.mxu1 %v573_v35  ;;  %v758_v35 = vld [vmem:[%s1957_s5 + $0x8] sm:$0xff] }
  0x2e   : > { %1426 = vmatprep.subr.mxu0 %v767_v41  ;;  %1528 = vmatprep.subr.mxu1 %v956_v37 }
  0x2f   : > { %1427 = vmatpush3.msra.mxu0 %v767_v41  ;;  %v1802_v41 = vld [vmem:[%s1959_s7 + $0x58] sm:$0xff] }
  0x30   : > { %1358 = vmatmul.mubr.msk.f32.gmra.mxu0 %vm363_vm0, %v351_v31  ;;  %1428 = vmatprep.subr.mxu0 %v766_v42 }
  0x31   : > { %1429 = vmatpush3.msra.mxu0 %v766_v42  ;;  %v1808_v42 = vld [vmem:[%s1959_s7 + $0x50] sm:$0xff] }
  0x32   : > { %1430 = vmatprep.subr.mxu0 %v765_v43 }
  0x33   : > { %1431 = vmatpush3.msra.mxu0 %v765_v43  ;;  %v1815_v43 = vld [vmem:[%s1959_s7 + $0x48] sm:$0xff] }
  0x34   : > { %1432 = vmatprep.subr.mxu0 %v764_v44 }
  0x35   : > { %1433 = vmatpush3.msra.mxu0 %v764_v44  ;;  %v1822_v44 = vld [vmem:[%s1959_s7 + $0x40] sm:$0xff] }
  0x36   : > { %1434 = vmatprep.subr.mxu0 %v763_v45 }
  0x37   : > { %1435 = vmatpush3.msra.mxu0 %v763_v45  ;;  %v1829_v45 = vld [vmem:[%s1959_s7 + $0x38] sm:$0xff] }
  0x38   : > { %1436 = vmatprep.subr.mxu0 %v762_v46 }
  0x39   : > { %1437 = vmatpush3.msra.mxu0 %v762_v46  ;;  %v1836_v46 = vld [vmem:[%s1959_s7 + $0x30] sm:$0xff] }
  0x3a   : > { %1438 = vmatprep.subr.mxu0 %v761_v47 }
  0x3b   : > { %1439 = vmatpush3.msra.mxu0 %v761_v47  ;;  %v1843_v47 = vld [vmem:[%s1959_s7 + $0x28] sm:$0xff] }
  0x3c   : > { %1440 = vmatprep.subr.mxu0 %v760_v48 }
  0x3d   : > { %1441 = vmatpush3.msra.mxu0 %v760_v48  ;;  %v1850_v48 = vld [vmem:[%s1959_s7 + $0x20] sm:$0xff] }
  0x3e   : > { %1442 = vmatprep.subr.mxu0 %v759_v34 }
  0x3f   : > { %1443 = vmatpush3.msra.mxu0 %v759_v34  ;;  %v944_v34 = vld [vmem:[%s1959_s7 + $0x18] sm:$0xff] }
  0x40   : > { %1444 = vmatprep.subr.mxu0 %v758_v35 }
  0x41   : > { %1445 = vmatpush3.msra.mxu0 %v758_v35  ;;  %v943_v35 = vld [vmem:[%s1959_s7 + $0x10] sm:$0xff] }
  0x42   : > { %1446 = vmatprep.subr.mxu0 %v757_v36 }
  0x43   : > { %1447 = vmatpush3.msra.mxu0 %v757_v36  ;;  %v942_v36 = vld [vmem:[%s1959_s7 + $0x8] sm:$0xff] }
  0x44   : > { %1472 = vmatprep.subr.mxu0 %v956_v37 }
  0xd4   : > { %v1338_v50 = vpop.f32.mrf.mxu0 }
  0xd5   : > { %v484_v51 = vadd.f32 %v1338_v50, %v1190_v49 }
  0xd6   : > { %v478_v52 = vpop.f32.mrf.mxu0 }
  0xd7   : > { %v479_v53 = vadd.f32 %v1190_v49, %v478_v52  ;;  %v558_v56 = vmax.f32 %v484_v51, 0.0 }
  0xd8   : > { %v1341_v54 = vpop.f32.mrf.mxu0 }
  0xd9   : > { %v557_v55 = vmax.f32 %v479_v53, 0.0  ;;  %v494_v57 = vadd.f32 %v1341_v54, %v1190_v49 }
  0xda   : > { %v488_v58 = vpop.f32.mrf.mxu0 }
  0xdb   : > { %v489_v59 = vadd.f32 %v1190_v49, %v488_v58  ;;  %1392 = vmatprep.mubr.f32.mxu1 %v557_v55  ;;  %v560_v62 = vmax.f32 %v494_v57, 0.0 }
  0xdc   : > { %v1344_v60 = vpop.f32.mrf.mxu0  ;;  %1393 = vmatmul.mubr.f32.vlgmr.msra.gmra.mxu1 %v558_v56 }
  0xdd   : > { %v559_v61 = vmax.f32 %v489_v59, 0.0  ;;  %v504_v63 = vadd.f32 %v1344_v60, %v1190_v49  ;;  %1544 = vmatpush3.msra.mxu1 %v956_v37 }
  0xde   : > { %v498_v0 = vpop.f32.mrf.mxu0  ;;  %1529 = vmatprep.subr.mxu1 %v955_v38 }
  0xdf   : > { %v499_v1 = vadd.f32 %v1190_v49, %v498_v0  ;;  %1395 = vmatprep.mubr.f32.mxu1 %v559_v61  ;;  %v562_v4 = vmax.f32 %v504_v63, 0.0  ;;  %1545 = vmatpush3.msra.mxu1 %v955_v38 }
  0xe0   : > { %v1347_v2 = vpop.f32.mrf.mxu0  ;;  %1396 = vmatmul.mubr.f32.gmra.mxu1 %v560_v62  ;;  %1530 = vmatprep.subr.mxu1 %v954_v39 }
  0xe1   : > { %v561_v3 = vmax.f32 %v499_v1, 0.0  ;;  %v514_v5 = vadd.f32 %v1347_v2, %v1190_v49  ;;  %1546 = vmatpush3.msra.mxu1 %v954_v39 }
  0xe2   : > { %v508_v6 = vpop.f32.mrf.mxu0  ;;  %1531 = vmatprep.subr.mxu1 %v953_v40 }
  0xe3   : > { %v509_v7 = vadd.f32 %v1190_v49, %v508_v6  ;;  %1398 = vmatprep.mubr.f32.mxu1 %v561_v3  ;;  %v564_v10 = vmax.f32 %v514_v5, 0.0  ;;  %1547 = vmatpush3.msra.mxu1 %v953_v40 }
  0xe4   : > { %v1350_v8 = vpop.f32.mrf.mxu0  ;;  %1399 = vmatmul.mubr.f32.gmra.mxu1 %v562_v4  ;;  %1532 = vmatprep.subr.mxu1 %v1802_v41 }
  0xe5   : > { %v563_v9 = vmax.f32 %v509_v7, 0.0  ;;  %v524_v11 = vadd.f32 %v1350_v8, %v1190_v49  ;;  %1548 = vmatpush3.msra.mxu1 %v1802_v41 }
  0xe6   : > { %v518_v12 = vpop.f32.mrf.mxu0  ;;  %1533 = vmatprep.subr.mxu1 %v1808_v42 }
  0xe7   : > { %v519_v13 = vadd.f32 %v1190_v49, %v518_v12  ;;  %1401 = vmatprep.mubr.f32.mxu1 %v563_v9  ;;  %v566_v16 = vmax.f32 %v524_v11, 0.0  ;;  %1549 = vmatpush3.msra.mxu1 %v1808_v42 }
  0xe8   : > { %v1353_v14 = vpop.f32.mrf.mxu0  ;;  %1402 = vmatmul.mubr.f32.gmra.mxu1 %v564_v10  ;;  %1534 = vmatprep.subr.mxu1 %v1815_v43 }
  0xe9   : > { %v565_v15 = vmax.f32 %v519_v13, 0.0  ;;  %v534_v17 = vadd.f32 %v1353_v14, %v1190_v49  ;;  %1550 = vmatpush3.msra.mxu1 %v1815_v43 }
  0xea   : > { %v528_v18 = vpop.f32.mrf.mxu0  ;;  %1535 = vmatprep.subr.mxu1 %v1822_v44 }
  0xeb   : > { %v529_v19 = vadd.f32 %v1190_v49, %v528_v18  ;;  %1404 = vmatprep.mubr.f32.mxu1 %v565_v15  ;;  %v568_v22 = vmax.f32 %v534_v17, 0.0  ;;  %1551 = vmatpush3.msra.mxu1 %v1822_v44 }
  0xec   : > { %v1356_v20 = vpop.f32.mrf.mxu0  ;;  %1405 = vmatmul.mubr.f32.gmra.mxu1 %v566_v16  ;;  %1536 = vmatprep.subr.mxu1 %v1829_v45 }
  0xed   : > { %v567_v21 = vmax.f32 %v529_v19, 0.0  ;;  %v544_v23 = vadd.f32 %v1356_v20, %v1190_v49  ;;  %1552 = vmatpush3.msra.mxu1 %v1829_v45 }
  0xee   : > { %v538_v24 = vpop.f32.mrf.mxu0  ;;  %1537 = vmatprep.subr.mxu1 %v1836_v46 }
  0xef   : > { %v539_v25 = vadd.f32 %v1190_v49, %v538_v24  ;;  %1407 = vmatprep.mubr.f32.mxu1 %v567_v21  ;;  %v570_v28 = vmax.f32 %v544_v23, 0.0  ;;  %1553 = vmatpush3.msra.mxu1 %v1836_v46 }
  0xf0   : > { %v1359_v26 = vpop.f32.mrf.mxu0  ;;  %1408 = vmatmul.mubr.f32.gmra.mxu1 %v568_v22  ;;  %1538 = vmatprep.subr.mxu1 %v1843_v47 }
  0xf1   : > { %v569_v27 = vmax.f32 %v539_v25, 0.0  ;;  %v554_v29 = vadd.f32 %v1359_v26, %v1190_v49  ;;  %1554 = vmatpush3.msra.mxu1 %v1843_v47 }
  0xf2   : > { %v548_v30 = vpop.f32.mrf.mxu0  ;;  %1539 = vmatprep.subr.mxu1 %v1850_v48 }
  0xf3   : > { %v549_v31 = vadd.f32 %v1190_v49, %v548_v30  ;;  %1410 = vmatprep.mubr.f32.mxu1 %v569_v27  ;;  %v572_v33 = vmax.f32 %v554_v29, 0.0  ;;  %1555 = vmatpush3.msra.mxu1 %v1850_v48  ;;  %v1858_v49 = vld [vmem:[%s1956_s4] ss:$0 sm:$0xff] }
  0xf4   : > { %1411 = vmatmul.mubr.f32.gmra.mxu1 %v570_v28  ;;  %1540 = vmatprep.subr.mxu1 %v944_v34 }
  0xf5   : > { %v571_v32 = vmax.f32 %v549_v31, 0.0  ;;  %1556 = vmatpush3.msra.mxu1 %v944_v34 }
  0xf6   : > { %1541 = vmatprep.subr.mxu1 %v943_v35 }
  0xf7   : > { %1413 = vmatprep.mubr.f32.mxu1 %v571_v32  ;;  %1557 = vmatpush3.msra.mxu1 %v943_v35 }
  0xf8   : > { %1414 = vmatmul.mubr.f32.gmra.mxu1 %v572_v33  ;;  %1542 = vmatprep.subr.mxu1 %v942_v36 }
  0xf9   : > { %1558 = vmatpush3.msra.mxu1 %v942_v36 }
 0x19c   : > { %v1394_v50 = vpop.f32.mrf.mxu1 }
 0x19d   : > { %v668_v51 = vadd.f32 %v1394_v50, %v1858_v49 }
 0x19e   : > { %v662_v52 = vpop.f32.mrf.mxu1 }
 0x19f   : > { %v663_v53 = vadd.f32 %v1858_v49, %v662_v52  ;;  %v742_v56 = vmax.f32 %v668_v51, 0.0 }
 0x1a0   : > { %v1397_v54 = vpop.f32.mrf.mxu1 }
 0x1a1   : > { %v741_v55 = vmax.f32 %v663_v53, 0.0  ;;  %v678_v57 = vadd.f32 %v1397_v54, %v1858_v49 }
 0x1a2   : > { %v672_v58 = vpop.f32.mrf.mxu1 }
 0x1a3   : > { %v673_v59 = vadd.f32 %v1858_v49, %v672_v58  ;;  %1448 = vmatprep.mubr.f32.mxu0 %v741_v55  ;;  %v744_v62 = vmax.f32 %v678_v57, 0.0 }
 0x1a4   : > { %v1400_v60 = vpop.f32.mrf.mxu1  ;;  %1449 = vmatmul.mubr.f32.vlgmr.msra.gmra.mxu0 %v742_v56 }
 0x1a5   : > { %v743_v61 = vmax.f32 %v673_v59, 0.0  ;;  %1473 = vmatpush3.msra.mxu0 %v956_v37  ;;  %v688_v63 = vadd.f32 %v1400_v60, %v1858_v49  ;;  %v941_v37 = vld [vmem:[%s1959_s7] sm:$0xff] }
 0x1a6   : > { %v682_v0 = vpop.f32.mrf.mxu1  ;;  %1474 = vmatprep.subr.mxu0 %v955_v38  ;;  %1543 = vmatprep.subr.mxu1 %v941_v37 }
 0x1a7   : > { %v683_v1 = vadd.f32 %v1858_v49, %v682_v0  ;;  %1451 = vmatprep.mubr.f32.mxu0 %v743_v61  ;;  %1475 = vmatpush3.msra.mxu0 %v955_v38  ;;  %v746_v4 = vmax.f32 %v688_v63, 0.0  ;;  %v1208_v38 = vld [vmem:[%s1958_s6] ss:$0 sm:$0xff] }
 0x1a8   : > { %v1403_v2 = vpop.f32.mrf.mxu1  ;;  %1452 = vmatmul.mubr.f32.gmra.mxu0 %v744_v62  ;;  %1476 = vmatprep.subr.mxu0 %v954_v39 }
 0x1a9   : > { %v745_v3 = vmax.f32 %v683_v1, 0.0  ;;  %1477 = vmatpush3.msra.mxu0 %v954_v39  ;;  %v698_v5 = vadd.f32 %v1403_v2, %v1858_v49  ;;  %1559 = vmatpush3.msra.mxu1 %v941_v37 }
 0x1aa   : > { %v692_v6 = vpop.f32.mrf.mxu1  ;;  %1478 = vmatprep.subr.mxu0 %v953_v40 }
 0x1ab   : > { %v693_v7 = vadd.f32 %v1858_v49, %v692_v6  ;;  %1454 = vmatprep.mubr.f32.mxu0 %v745_v3  ;;  %1479 = vmatpush3.msra.mxu0 %v953_v40  ;;  %v748_v10 = vmax.f32 %v698_v5, 0.0 }
 0x1ac   : > { %v1406_v8 = vpop.f32.mrf.mxu1  ;;  %1455 = vmatmul.mubr.f32.gmra.mxu0 %v746_v4  ;;  %1480 = vmatprep.subr.mxu0 %v1802_v41 }
 0x1ad   : > { %v747_v9 = vmax.f32 %v693_v7, 0.0  ;;  %1481 = vmatpush3.msra.mxu0 %v1802_v41  ;;  %v708_v11 = vadd.f32 %v1406_v8, %v1858_v49 }
 0x1ae   : > { %v702_v12 = vpop.f32.mrf.mxu1  ;;  %1482 = vmatprep.subr.mxu0 %v1808_v42 }
 0x1af   : > { %v703_v13 = vadd.f32 %v1858_v49, %v702_v12  ;;  %1457 = vmatprep.mubr.f32.mxu0 %v747_v9  ;;  %1483 = vmatpush3.msra.mxu0 %v1808_v42  ;;  %v750_v16 = vmax.f32 %v708_v11, 0.0 }
 0x1b0   : > { %v1409_v14 = vpop.f32.mrf.mxu1  ;;  %1458 = vmatmul.mubr.f32.gmra.mxu0 %v748_v10  ;;  %1484 = vmatprep.subr.mxu0 %v1815_v43 }
 0x1b1   : > { %v749_v15 = vmax.f32 %v703_v13, 0.0  ;;  %1485 = vmatpush3.msra.mxu0 %v1815_v43  ;;  %v718_v17 = vadd.f32 %v1409_v14, %v1858_v49 }
 0x1b2   : > { %v712_v18 = vpop.f32.mrf.mxu1  ;;  %1486 = vmatprep.subr.mxu0 %v1822_v44 }
 0x1b3   : > { %v713_v19 = vadd.f32 %v1858_v49, %v712_v18  ;;  %1460 = vmatprep.mubr.f32.mxu0 %v749_v15  ;;  %1487 = vmatpush3.msra.mxu0 %v1822_v44  ;;  %v752_v22 = vmax.f32 %v718_v17, 0.0 }
 0x1b4   : > { %v1412_v20 = vpop.f32.mrf.mxu1  ;;  %1461 = vmatmul.mubr.f32.gmra.mxu0 %v750_v16  ;;  %1488 = vmatprep.subr.mxu0 %v1829_v45 }
 0x1b5   : > { %v751_v21 = vmax.f32 %v713_v19, 0.0  ;;  %1489 = vmatpush3.msra.mxu0 %v1829_v45  ;;  %v728_v23 = vadd.f32 %v1412_v20, %v1858_v49 }
 0x1b6   : > { %v722_v24 = vpop.f32.mrf.mxu1  ;;  %1490 = vmatprep.subr.mxu0 %v1836_v46 }
 0x1b7   : > { %v723_v25 = vadd.f32 %v1858_v49, %v722_v24  ;;  %1463 = vmatprep.mubr.f32.mxu0 %v751_v21  ;;  %1491 = vmatpush3.msra.mxu0 %v1836_v46  ;;  %v754_v28 = vmax.f32 %v728_v23, 0.0  ;;  %v1209_v23 = vld [vmem:[%s1960_s8] ss:$0 sm:$0xff] }
 0x1b8   : > { %v1415_v26 = vpop.f32.mrf.mxu1  ;;  %1464 = vmatmul.mubr.f32.gmra.mxu0 %v752_v22  ;;  %1492 = vmatprep.subr.mxu0 %v1843_v47 }
 0x1b9   : > { %v753_v27 = vmax.f32 %v723_v25, 0.0  ;;  %1493 = vmatpush3.msra.mxu0 %v1843_v47  ;;  %v738_v29 = vadd.f32 %v1415_v26, %v1858_v49 }
 0x1ba   : > { %v732_v30 = vpop.f32.mrf.mxu1  ;;  %1494 = vmatprep.subr.mxu0 %v1850_v48 }
 0x1bb   : > { %v733_v31 = vadd.f32 %v1858_v49, %v732_v30  ;;  %1466 = vmatprep.mubr.f32.mxu0 %v753_v27  ;;  %1495 = vmatpush3.msra.mxu0 %v1850_v48  ;;  %v756_v33 = vmax.f32 %v738_v29, 0.0 }
 0x1bc   : > { %1467 = vmatmul.mubr.f32.gmra.mxu0 %v754_v28  ;;  %1496 = vmatprep.subr.mxu0 %v944_v34 }
 0x1bd   : > { %v755_v32 = vmax.f32 %v733_v31, 0.0  ;;  %1497 = vmatpush3.msra.mxu0 %v944_v34 }
 0x1be   : > { %1498 = vmatprep.subr.mxu0 %v943_v35 }
 0x1bf   : > { %1469 = vmatprep.mubr.f32.mxu0 %v755_v32  ;;  %1499 = vmatpush3.msra.mxu0 %v943_v35 }
 0x1c0   : > { %1470 = vmatmul.mubr.f32.gmra.mxu0 %v756_v33  ;;  %1500 = vmatprep.subr.mxu0 %v942_v36 }
 0x1c1   : > { %1501 = vmatpush3.msra.mxu0 %v942_v36 }
 0x1c2   : > { %1502 = vmatprep.subr.mxu0 %v941_v37 }
 0x1c3   : > { %1503 = vmatpush3.msra.mxu0 %v941_v37 }
 0x264   : > { %v1450_v39 = vpop.f32.mrf.mxu0 }
 0x265   : > { %v852_v40 = vadd.f32 %v1450_v39, %v1208_v38 }
 0x266   : > { %v846_v41 = vpop.f32.mrf.mxu0 }
 0x267   : > { %v847_v42 = vadd.f32 %v1208_v38, %v846_v41  ;;  %v926_v45 = vmax.f32 %v852_v40, 0.0 }
 0x268   : > { %v1453_v43 = vpop.f32.mrf.mxu0 }
 0x269   : > { %v925_v44 = vmax.f32 %v847_v42, 0.0  ;;  %v862_v46 = vadd.f32 %v1453_v43, %v1208_v38 }
 0x26a   : > { %v856_v47 = vpop.f32.mrf.mxu0 }
 0x26b   : > { %v857_v48 = vadd.f32 %v1208_v38, %v856_v47  ;;  %1504 = vmatprep.mubr.f32.mxu0 %v925_v44  ;;  %v928_v51 = vmax.f32 %v862_v46, 0.0 }
 0x26c   : > { %v1456_v49 = vpop.f32.mrf.mxu0  ;;  %1505 = vmatmul.mubr.f32.vlgmr.msra.gmra.mxu0 %v926_v45 }
 0x26d   : > { %v927_v50 = vmax.f32 %v857_v48, 0.0  ;;  %v872_v52 = vadd.f32 %v1456_v49, %v1208_v38 }
 0x26e   : > { %v866_v53 = vpop.f32.mrf.mxu0 }
 0x26f   : > { %v867_v54 = vadd.f32 %v1208_v38, %v866_v53  ;;  %1507 = vmatprep.mubr.f32.mxu0 %v927_v50  ;;  %v930_v57 = vmax.f32 %v872_v52, 0.0 }
 0x270   : > { %v1459_v55 = vpop.f32.mrf.mxu0  ;;  %1508 = vmatmul.mubr.f32.gmra.mxu0 %v928_v51 }
 0x271   : > { %v929_v56 = vmax.f32 %v867_v54, 0.0  ;;  %v882_v58 = vadd.f32 %v1459_v55, %v1208_v38 }
 0x272   : > { %v876_v59 = vpop.f32.mrf.mxu0 }
 0x273   : > { %v877_v60 = vadd.f32 %v1208_v38, %v876_v59  ;;  %1510 = vmatprep.mubr.f32.mxu0 %v929_v56  ;;  %v932_v63 = vmax.f32 %v882_v58, 0.0 }
 0x274   : > { %v1462_v61 = vpop.f32.mrf.mxu0  ;;  %1511 = vmatmul.mubr.f32.gmra.mxu0 %v930_v57 }
 0x275   : > { %v931_v62 = vmax.f32 %v877_v60, 0.0  ;;  %v892_v0 = vadd.f32 %v1462_v61, %v1208_v38 }
 0x276   : > { %v886_v1 = vpop.f32.mrf.mxu0 }
 0x277   : > { %v887_v2 = vadd.f32 %v1208_v38, %v886_v1  ;;  %1513 = vmatprep.mubr.f32.mxu1 %v931_v62  ;;  %v934_v5 = vmax.f32 %v892_v0, 0.0 }
 0x278   : > { %v1465_v3 = vpop.f32.mrf.mxu0  ;;  %1514 = vmatmul.mubr.f32.vlgmr.msra.gmra.mxu1 %v932_v63 }
 0x279   : > { %v933_v4 = vmax.f32 %v887_v2, 0.0  ;;  %v902_v6 = vadd.f32 %v1465_v3, %v1208_v38 }
 0x27a   : > { %v896_v7 = vpop.f32.mrf.mxu0 }
 0x27b   : > { %v897_v8 = vadd.f32 %v1208_v38, %v896_v7  ;;  %1516 = vmatprep.mubr.f32.mxu1 %v933_v4  ;;  %v936_v11 = vmax.f32 %v902_v6, 0.0 }
 0x27c   : > { %v1468_v9 = vpop.f32.mrf.mxu0  ;;  %1517 = vmatmul.mubr.f32.gmra.mxu1 %v934_v5 }
 0x27d   : > { %v935_v10 = vmax.f32 %v897_v8, 0.0  ;;  %v912_v12 = vadd.f32 %v1468_v9, %v1208_v38 }
 0x27e   : > { %v906_v13 = vpop.f32.mrf.mxu0 }
 0x27f   : > { %v907_v14 = vadd.f32 %v1208_v38, %v906_v13  ;;  %1519 = vmatprep.mubr.f32.mxu1 %v935_v10  ;;  %v938_v17 = vmax.f32 %v912_v12, 0.0 }
 0x280   : > { %v1471_v15 = vpop.f32.mrf.mxu0  ;;  %1520 = vmatmul.mubr.f32.gmra.mxu1 %v936_v11 }
 0x281   : > { %v937_v16 = vmax.f32 %v907_v14, 0.0  ;;  %v922_v18 = vadd.f32 %v1471_v15, %v1208_v38 }
 0x282   : > { %v916_v19 = vpop.f32.mrf.mxu0 }
 0x283   : > { %v917_v20 = vadd.f32 %v1208_v38, %v916_v19  ;;  %1522 = vmatprep.mubr.f32.mxu1 %v937_v16  ;;  %v940_v22 = vmax.f32 %v922_v18, 0.0 }
 0x284   : > { %1523 = vmatmul.mubr.f32.gmra.mxu1 %v938_v17 }
 0x285   : > { %v939_v21 = vmax.f32 %v917_v20, 0.0 }
 0x287   : > { %1525 = vmatprep.mubr.f32.mxu1 %v939_v21 }
 0x288   : > { %1526 = vmatmul.mubr.f32.gmra.mxu1 %v940_v22 }
 0x32c   : > { %v1506_v24 = vpop.f32.mrf.mxu0 }
 0x32d   : > { %v1036_v25 = vadd.f32 %v1506_v24, %v1209_v23 }
 0x32e   : > { %v1030_v26 = vpop.f32.mrf.mxu0 }
 0x32f   : > { %1110 = vst.msk [vmem:[%s1915_s21 + $0x8] sm:$0xff] %vm363_vm0, %v1036_v25  ;;  %v1031_v27 = vadd.f32 %v1209_v23, %v1030_v26 }
 0x330   : > { %v1509_v28 = vpop.f32.mrf.mxu0 }
 0x331   : > { %1109 = vst.msk [vmem:[%s1915_s21] sm:$0xff] %vm363_vm0, %v1031_v27  ;;  %v1046_v29 = vadd.f32 %v1509_v28, %v1209_v23 }
 0x332   : > { %v1040_v30 = vpop.f32.mrf.mxu0 }
 0x333   : > { %1112 = vst.msk [vmem:[%s1915_s21 + $0x18] sm:$0xff] %vm363_vm0, %v1046_v29  ;;  %v1041_v31 = vadd.f32 %v1209_v23, %v1040_v30 }
 0x334   : > { %v1512_v32 = vpop.f32.mrf.mxu0 }
 0x335   : > { %1111 = vst.msk [vmem:[%s1915_s21 + $0x10] sm:$0xff] %vm363_vm0, %v1041_v31  ;;  %v1056_v33 = vadd.f32 %v1512_v32, %v1209_v23 }
 0x336   : > { %v1050_v34 = vpop.f32.mrf.mxu0 }
 0x337   : > { %1114 = vst.msk [vmem:[%s1915_s21 + $0x28] sm:$0xff] %vm363_vm0, %v1056_v33  ;;  %v1051_v35 = vadd.f32 %v1209_v23, %v1050_v34 }
 0x338   : > { %v1515_v36 = vpop.f32.mrf.mxu1 }
 0x339   : > { %1113 = vst.msk [vmem:[%s1915_s21 + $0x20] sm:$0xff] %vm363_vm0, %v1051_v35  ;;  %v1066_v37 = vadd.f32 %v1515_v36, %v1209_v23 }
 0x33a   : > { %v1060_v38 = vpop.f32.mrf.mxu1 }
 0x33b   : > { %1116 = vst.msk [vmem:[%s1915_s21 + $0x38] sm:$0xff] %vm363_vm0, %v1066_v37  ;;  %v1061_v39 = vadd.f32 %v1209_v23, %v1060_v38 }
 0x33c   : > { %v1518_v40 = vpop.f32.mrf.mxu1 }
 0x33d   : > { %1115 = vst.msk [vmem:[%s1915_s21 + $0x30] sm:$0xff] %vm363_vm0, %v1061_v39  ;;  %v1076_v41 = vadd.f32 %v1518_v40, %v1209_v23 }
 0x33e   : > { %v1070_v42 = vpop.f32.mrf.mxu1 }
 0x33f   : > { %1118 = vst.msk [vmem:[%s1915_s21 + $0x48] sm:$0xff] %vm363_vm0, %v1076_v41  ;;  %v1071_v43 = vadd.f32 %v1209_v23, %v1070_v42 }
 0x340   : > { %v1521_v44 = vpop.f32.mrf.mxu1 }
 0x341   : > { %1117 = vst.msk [vmem:[%s1915_s21 + $0x40] sm:$0xff] %vm363_vm0, %v1071_v43  ;;  %v1086_v45 = vadd.f32 %v1521_v44, %v1209_v23 }
 0x342   : > { %v1080_v46 = vpop.f32.mrf.mxu1 }
 0x343   : > { %1120 = vst.msk [vmem:[%s1915_s21 + $0x58] sm:$0xff] %vm363_vm0, %v1086_v45  ;;  %v1081_v47 = vadd.f32 %v1209_v23, %v1080_v46 }
 0x344   : > { %v1524_v48 = vpop.f32.mrf.mxu1 }
 0x345   : > { %1119 = vst.msk [vmem:[%s1915_s21 + $0x50] sm:$0xff] %vm363_vm0, %v1081_v47  ;;  %v1096_v49 = vadd.f32 %v1524_v48, %v1209_v23 }
 0x346   : > { %v1090_v50 = vpop.f32.mrf.mxu1 }
 0x347   : > { %1122 = vst.msk [vmem:[%s1915_s21 + $0x68] sm:$0xff] %vm363_vm0, %v1096_v49  ;;  %v1091_v51 = vadd.f32 %v1209_v23, %v1090_v50 }
 0x348   : > { %v1527_v52 = vpop.f32.mrf.mxu1 }
 0x349   : > { %1121 = vst.msk [vmem:[%s1915_s21 + $0x60] sm:$0xff] %vm363_vm0, %v1091_v51  ;;  %v1106_v53 = vadd.f32 %v1527_v52, %v1209_v23 }
 0x34a   : > { %v1100_v54 = vpop.f32.mrf.mxu1 }
 0x34b   : > { %1124 = vst.msk [vmem:[%s1915_s21 + $0x78] sm:$0xff] %vm363_vm0, %v1106_v53  ;;  %v1101_v55 = vadd.f32 %v1209_v23, %v1100_v54 }
 0x34d   : > { %1123 = vst.msk [vmem:[%s1915_s21 + $0x70] sm:$0xff] %vm363_vm0, %v1101_v55 }
 0x34e PF: > { %s19_s30 = sadd.s32 1, %s1574_s30  }
 0x34f   : > { %p16_p4 = scmp.ge.s32.totalorder %s19_s30, 6  }
 0x351   :  { %18 = sbr.rel (!%p16_p4) target bundleno = 1 (0x1), region = 86 }

</bundles_post_ra>
